<compile_context>
chip_gen: v7x
topology: tpu7x:2x2x1
jax: 0.10.0
libtpu: 0.0.40
codegen_flags: <defaults>
</compile_context>

<pallas_src>
import functools

import jax
import jax.numpy as jnp
from jax.experimental import pallas as pl
from jax.experimental.pallas import tpu as pltpu

# Generation-safe VMEM budgeting (v7x has only 64 MiB VMEM / TC).
_VMEM_LIMIT_BYTES = 32 * 1024 * 1024        # scoped VMEM limit requested
_TILE_BUDGET_BYTES = 24 * 1024 * 1024       # double-buffered in + out tiles


def _prompt_end_kernel(prefix_ref, ctx_ref, suffix_ref, out_ref, *, csc):
    """Assemble (BC, seq, D) prompt embeddings for one block of BC classes."""
    dtype = out_ref.dtype
    bc = out_ref.shape[0]
    pre = prefix_ref[...].astype(dtype)                     # (BC, 1, D)
    suf = suffix_ref[...].astype(dtype)                     # (BC, n_suf, D)
    if csc:
        ctx = ctx_ref[...].astype(dtype)                    # (BC, n_ctx, D)
    else:
        # Generic context: broadcast the shared (n_ctx, D) block over classes
        # (this reproduces ctx.unsqueeze(0).expand(n_cls, -1, -1)).
        ctx = jnp.broadcast_to(ctx_ref[...].astype(dtype)[None, :, :],
                               (bc,) + ctx_ref.shape)
    # Single lane-dense, full-tile store -- no masked partial row writes.
    out_ref[...] = jnp.concatenate([pre, ctx, suf], axis=1)


def _pick_block_classes(n_cls, n_ctx, n_suf, seq, ctx_dim, itemsize, csc,
                        max_block_classes=None):
    """Largest class-block that keeps double-buffered tiles under budget."""
    rows_per_class = 1 + n_suf + seq + (n_ctx if csc else 0)
    per_class_bytes = 2 * rows_per_class * ctx_dim * itemsize   # x2: double buffer
    cap = max(1, _TILE_BUDGET_BYTES // max(per_class_bytes, 1))
    if max_block_classes is not None:
        cap = min(cap, max_block_classes)
    return max(1, min(n_cls, cap))


def prompt_learner_forward(ctx, token_prefix, token_suffix,
                           class_token_position="end",
                           out_dtype=None, max_block_classes=None):
    """Pallas implementation of PromptLearner.forward().

    ctx:          (n_ctx, ctx_dim) generic context or (n_cls, n_ctx, ctx_dim) CSC.
    token_prefix: (n_cls, 1, ctx_dim)            -- SOS embedding per class.
    token_suffix: (n_cls, seq-1-n_ctx, ctx_dim)  -- class tokens + EOS + pad.
    returns:      (n_cls, seq, ctx_dim) prompt embeddings.
    """
    if class_token_position != "end":
        # TODO(synk): 'middle'/'front' need per-class name_lens-dependent row
        # placement (scalar-prefetch of name_lens + masked / DMA row windows);
        # only 'end' is implemented.
        raise NotImplementedError("only class_token_position='end' is implemented")

    n_cls, _, ctx_dim = token_prefix.shape
    n_suf = token_suffix.shape[1]
    csc = ctx.ndim == 3
    n_ctx = ctx.shape[1] if csc else ctx.shape[0]
    seq = 1 + n_ctx + n_suf
    dtype = jnp.dtype(out_dtype) if out_dtype is not None else token_prefix.dtype

    bc = _pick_block_classes(n_cls, n_ctx, n_suf, seq, ctx_dim,
                             dtype.itemsize, csc, max_block_classes)
    grid = (pl.cdiv(n_cls, bc),)

    if csc:
        ctx_spec = pl.BlockSpec((bc, n_ctx, ctx_dim), lambda i: (i, 0, 0))
    else:
        # Shared context: every grid step sees the full (n_ctx, D) block.
        ctx_spec = pl.BlockSpec((n_ctx, ctx_dim), lambda i: (0, 0))

    kernel = functools.partial(_prompt_end_kernel, csc=csc)

    return pl.pallas_call(
        kernel,
        out_shape=jax.ShapeDtypeStruct((n_cls, seq, ctx_dim), dtype),
        grid_spec=pltpu.PrefetchScalarGridSpec(
            num_scalar_prefetch=0,
            grid=grid,
            in_specs=[
                pl.BlockSpec((bc, 1, ctx_dim), lambda i: (i, 0, 0)),      # prefix
                ctx_spec,                                                  # ctx
                pl.BlockSpec((bc, n_suf, ctx_dim), lambda i: (i, 0, 0)),   # suffix
            ],
            out_specs=pl.BlockSpec((bc, seq, ctx_dim), lambda i: (i, 0, 0)),
        ),
        compiler_params=pltpu.CompilerParams(
            dimension_semantics=("parallel",),
            vmem_limit_bytes=_VMEM_LIMIT_BYTES),
        # Argument order matches in_specs order (prefix, ctx, suffix).
    )(token_prefix, ctx, token_suffix)


def _reference_forward(ctx, token_prefix, token_suffix, out_dtype=None):
    dtype = out_dtype if out_dtype is not None else token_prefix.dtype
    n_cls = token_prefix.shape[0]
    if ctx.ndim == 2:
        ctx = jnp.broadcast_to(ctx[None], (n_cls,) + ctx.shape)
    return jnp.concatenate([token_prefix.astype(dtype), ctx.astype(dtype),
                            token_suffix.astype(dtype)], axis=1)


if __name__ == "__main__":
    # Small synthetic configuration consistent with the module:
    #   n_cls classnames, n_ctx learnable context tokens, ctx_dim embedding dim,
    #   seq total tokenized length (CLIP would use 77 / 512; small here).
    n_cls, n_ctx, ctx_dim, seq = 8, 4, 32, 16
    n_suf = seq - 1 - n_ctx
    dtype = jnp.float32

    key = jax.random.PRNGKey(0)
    k_emb, k_ctx = jax.random.split(key)

    # Deterministic synthetic "token_embedding(tokenized_prompts)" output.
    embedding = jax.random.normal(k_emb, (n_cls, seq, ctx_dim), dtype=dtype)
    token_prefix = embedding[:, :1, :]              # SOS
    token_suffix = embedding[:, 1 + n_ctx:, :]      # class tokens, EOS, padding

    # nn.init.normal_(ctx_vectors, std=0.02) -- generic (non-CSC) context.
    ctx = 0.02 * jax.random.normal(k_ctx, (n_ctx, ctx_dim), dtype=dtype)

    # 1) Generic context, single class-block.
    prompts = jax.block_until_ready(
        prompt_learner_forward(ctx, token_prefix, token_suffix))
    ref = _reference_forward(ctx, token_prefix, token_suffix)
    assert prompts.shape == (n_cls, seq, ctx_dim), prompts.shape
    assert jnp.allclose(prompts, ref), "mismatch vs reference concat"

    # 2) Multi-step class-blocked grid (exercises the blocked path).
    prompts_blk = jax.block_until_ready(
        prompt_learner_forward(ctx, token_prefix, token_suffix,
                               max_block_classes=4))
    assert jnp.allclose(prompts_blk, ref), "mismatch vs reference (blocked grid)"

    # 3) Class-specific-context (CSC) branch.
    ctx_csc = 0.02 * jax.random.normal(k_ctx, (n_cls, n_ctx, ctx_dim), dtype=dtype)
    prompts_csc = jax.block_until_ready(
        prompt_learner_forward(ctx_csc, token_prefix, token_suffix))
    ref_csc = _reference_forward(ctx_csc, token_prefix, token_suffix)
    assert jnp.allclose(prompts_csc, ref_csc), "mismatch vs reference (CSC)"

    # 4) bf16 output with the fp32 ctx cast fused inside the kernel.
    pre16 = token_prefix.astype(jnp.bfloat16)
    suf16 = token_suffix.astype(jnp.bfloat16)
    prompts16 = jax.block_until_ready(
        prompt_learner_forward(ctx, pre16, suf16))
    ref16 = _reference_forward(ctx, pre16, suf16, out_dtype=jnp.bfloat16)
    assert prompts16.dtype == jnp.bfloat16
    assert jnp.allclose(prompts16.astype(jnp.float32),
                        ref16.astype(jnp.float32)), "mismatch vs reference (bf16)"

    print("KERNEL_OK")
</pallas_src>

<mosaic_0001>
module attributes {stable_mosaic.version = 11 : i64} {
  func.func @_prompt_end_kernel(%arg0: i32, %arg1: memref<8x1x32xf32, #tpu.memory_space<vmem>>, %arg2: memref<4x32xf32, #tpu.memory_space<vmem>>, %arg3: memref<8x11x32xf32, #tpu.memory_space<vmem>>, %arg4: memref<8x16x32xf32, #tpu.memory_space<vmem>>) attributes {dimension_semantics = [#tpu.dimension_semantics<parallel>], iteration_bounds = array<i64: 1>, scalar_prefetch = 0 : i64, scratch_operands = 0 : i64, tpu.core_type = #tpu.core_type<tc>, window_params = [{transform_indices = @transform_0, window_bounds = array<i64: 8, 1, 32>}, {pipeline_mode = #tpu.pipeline_mode<synchronous>, transform_indices = @transform_1, window_bounds = array<i64: 4, 32>}, {transform_indices = @transform_2, window_bounds = array<i64: 8, 11, 32>}, {transform_indices = @transform_3, window_bounds = array<i64: 8, 16, 32>}]} {
    %c0 = arith.constant 0 : index
    %c0_0 = arith.constant 0 : index
    %c0_1 = arith.constant 0 : index
    %0 = vector.load %arg1[%c0, %c0_0, %c0_1] : memref<8x1x32xf32, #tpu.memory_space<vmem>>, vector<8x1x32xf32>
    %c0_2 = arith.constant 0 : index
    %c0_3 = arith.constant 0 : index
    %c0_4 = arith.constant 0 : index
    %1 = vector.load %arg3[%c0_2, %c0_3, %c0_4] : memref<8x11x32xf32, #tpu.memory_space<vmem>>, vector<8x11x32xf32>
    %c0_5 = arith.constant 0 : index
    %c0_6 = arith.constant 0 : index
    %2 = vector.load %arg2[%c0_5, %c0_6] : memref<4x32xf32, #tpu.memory_space<vmem>>, vector<4x32xf32>
    %3 = vector.shape_cast %2 : vector<4x32xf32> to vector<1x4x32xf32>
    %4 = vector.shape_cast %3 : vector<1x4x32xf32> to vector<1x4x32xf32>
    %5 = vector.broadcast %4 : vector<1x4x32xf32> to vector<8x4x32xf32>
    %6 = tpu.concatenate %0, %5, %1 in 1 : vector<8x1x32xf32>, vector<8x4x32xf32>, vector<8x11x32xf32> -> vector<8x16x32xf32>
    %c0_7 = arith.constant 0 : index
    %c0_8 = arith.constant 0 : index
    %c0_9 = arith.constant 0 : index
    %7 = vector.load %arg4[%c0_7, %c0_8, %c0_9] : memref<8x16x32xf32, #tpu.memory_space<vmem>>, vector<8x16x32xf32>
    tpu.vector_store %arg4[%c0_7, %c0_8, %c0_9], %6 {strides = array<i32>} : memref<8x16x32xf32, #tpu.memory_space<vmem>>, vector<8x16x32xf32>,
    return
  }
  func.func @transform_0(%arg0: i32) -> (i32, i32, i32) {
    %c0_i32 = arith.constant 0 : i32
    %c0_i32_0 = arith.constant 0 : i32
    %c0_i32_1 = arith.constant 0 : i32
    return %arg0, %c0_i32, %c0_i32_0 : i32, i32, i32
  }
  func.func @transform_1(%arg0: i32) -> (i32, i32) {
    %c0_i32 = arith.constant 0 : i32
    %c0_i32_0 = arith.constant 0 : i32
    %c0_i32_1 = arith.constant 0 : i32
    return %c0_i32, %c0_i32_0 : i32, i32
  }
  func.func @transform_2(%arg0: i32) -> (i32, i32, i32) {
    %c0_i32 = arith.constant 0 : i32
    %c0_i32_0 = arith.constant 0 : i32
    %c0_i32_1 = arith.constant 0 : i32
    return %arg0, %c0_i32, %c0_i32_0 : i32, i32, i32
  }
  func.func @transform_3(%arg0: i32) -> (i32, i32, i32) {
    %c0_i32 = arith.constant 0 : i32
    %c0_i32_0 = arith.constant 0 : i32
    %c0_i32_1 = arith.constant 0 : i32
    return %arg0, %c0_i32, %c0_i32_0 : i32, i32, i32
  }
}

</mosaic_0001>

<bundles_post_ra>
// kernel: tpu_custom_call.1
= control target key start
LH: loop header
LB: loop body
LE: loop exit
PB: predicated region body
PF: predicated region fallthrough
CT: control target
= control target key end

     0   :  { %vm59_vm0 = vcmask 1044480   ;;  %vm100_vm1 = vcmask 1040384   ;;  %vm117_vm2 = vcmask 261120   ;;  %s337_s0 = inlined_call_operand.vmem [shape: f32[8,1,32], index: 0, kind: input, shape index: {}]   ;;  %s338_s1 = inlined_call_operand.vmem [shape: f32[4,32], index: 1, kind: input, shape index: {}]   ;;  %s339_s2 = inlined_call_operand.vmem [shape: f32[8,11,32], index: 2, kind: input, shape index: {}]   ;;  %s340_s3 = inlined_call_operand.hbm [shape: f32[8,16,32], index: 3, kind: output, shape index: {}]  }
   0x1   :  { %v15_v0 = vld [vmem:[%s337_s0] sm:$0x1]  ;;  %v24_v5 = vld [vmem:[%s339_s2 + $0x8] sm:$0x7]  ;;  %v16_v7 = vld [vmem:[%s337_s0 + $0x1] sm:$0x1] }
   0x2   :  { %v23_v1 = vld [vmem:[%s339_s2] sm:$0xff]  ;;  %v61_v6 = vrot.slane %v24_v5, 3  ;;  %v25_v8 = vld [vmem:[%s339_s2 + $0x10] sm:$0xff]  ;;  %v26_v9 = vld [vmem:[%s339_s2 + $0x18] sm:$0x7] }
   0x3   :  { %v39_v2 = vld [vmem:[%s338_s1] sm:$0xf]  ;;  %v60_v4 = vrot.slane %v23_v1, 3  ;;  %v63_v11 = vrot.slane %v25_v8, 3  ;;  %v64_v13 = vrot.slane %v26_v9, 3  ;;  %v29_v16 = vld [vmem:[%s339_s2 + $0x30] sm:$0xff] }
   0x4   :  { %v209_v3 = vrot.slane %v39_v2, 7  ;;  %v17_v14 = vld [vmem:[%s337_s0 + $0x2] sm:$0x1]  ;;  %v28_v21 = vld [vmem:[%s339_s2 + $0x28] sm:$0x7]  ;;  %v69_v27 = vrot.slane %v29_v16, 3 }
   0x5   :  { %v27_v15 = vld [vmem:[%s339_s2 + $0x20] sm:$0xff]  ;;  %v62_v18 = vsel %vm59_vm0, %v60_v4, %v61_v6  ;;  %v65_v25 = vsel %vm59_vm0, %v63_v11, %v64_v13  ;;  %v67_v26 = vrot.slane %v28_v21, 3  ;;  %v30_v28 = vld [vmem:[%s339_s2 + $0x38] sm:$0x7]  ;;  %v32_v34 = vld [vmem:[%s339_s2 + $0x48] sm:$0x7] }
   0x6   :  { %v101_v10 = vsel %vm100_vm1, %v15_v0, %v209_v3  ;;  %v102_v12 = vsel %vm100_vm1, %v16_v7, %v209_v3  ;;  %v66_v19 = vrot.slane %v27_v15, 3  ;;  %v103_v20 = vsel %vm100_vm1, %v17_v14, %v209_v3  ;;  %v18_v22 = vld [vmem:[%s337_s0 + $0x3] sm:$0x1]  ;;  %119 = vst.msk [vmem:[#allocation2 + $0x8] sm:$0xff] %vm117_vm2, %v62_v18  ;;  %v19_v29 = vld [vmem:[%s337_s0 + $0x4] sm:$0x1] }
   0x7   :  { %v109_v17 = vsel %vm59_vm0, %v101_v10, %v60_v4  ;;  %v31_v23 = vld [vmem:[%s339_s2 + $0x40] sm:$0xff]  ;;  %v110_v24 = vsel %vm59_vm0, %v102_v12, %v63_v11  ;;  %121 = vst.msk [vmem:[#allocation2 + $0x18] sm:$0xff] %vm117_vm2, %v65_v25  ;;  %v104_v31 = vsel %vm100_vm1, %v18_v22, %v209_v3  ;;  %v70_v32 = vrot.slane %v30_v28, 3  ;;  %v33_v40 = vld [vmem:[%s339_s2 + $0x50] sm:$0xff]  ;;  %v34_v41 = vld [vmem:[%s339_s2 + $0x58] sm:$0x7] }
   0x8   :  { %118 = vst.msk [vmem:[#allocation2] sm:$0xff] %vm117_vm2, %v109_v17  ;;  %120 = vst.msk [vmem:[#allocation2 + $0x10] sm:$0xff] %vm117_vm2, %v110_v24  ;;  %v111_v30 = vsel %vm59_vm0, %v103_v20, %v66_v19  ;;  %v72_v33 = vrot.slane %v31_v23, 3  ;;  %v20_v35 = vld [vmem:[%s337_s0 + $0x5] sm:$0x1]  ;;  %v68_v36 = vsel %vm59_vm0, %v66_v19, %v67_v26  ;;  %v112_v37 = vsel %vm59_vm0, %v104_v31, %v69_v27  ;;  %v37_v54 = vld [vmem:[%s339_s2 + $0x70] sm:$0xff] }
   0x9   :  { %122 = vst.msk [vmem:[#allocation2 + $0x20] sm:$0xff] %vm117_vm2, %v111_v30  ;;  %v105_v38 = vsel %vm100_vm1, %v19_v29, %v209_v3  ;;  %v73_v39 = vrot.slane %v32_v34, 3  ;;  %v21_v42 = vld [vmem:[%s337_s0 + $0x6] sm:$0x1]  ;;  %123 = vst.msk [vmem:[#allocation2 + $0x28] sm:$0xff] %vm117_vm2, %v68_v36  ;;  %v71_v43 = vsel %vm59_vm0, %v69_v27, %v70_v32  ;;  %v75_v45 = vrot.slane %v33_v40, 3 }
   0xa   :  { %124 = vst.msk [vmem:[#allocation2 + $0x30] sm:$0xff] %vm117_vm2, %v112_v37  ;;  %v113_v44 = vsel %vm59_vm0, %v105_v38, %v72_v33  ;;  %v106_v46 = vsel %vm100_vm1, %v20_v35, %v209_v3  ;;  %v35_v47 = vld [vmem:[%s339_s2 + $0x60] sm:$0xff]  ;;  %v36_v48 = vld [vmem:[%s339_s2 + $0x68] sm:$0x7]  ;;  %125 = vst.msk [vmem:[#allocation2 + $0x38] sm:$0xff] %vm117_vm2, %v71_v43  ;;  %v76_v51 = vrot.slane %v34_v41, 3  ;;  %v107_v53 = vsel %vm100_vm1, %v21_v42, %v209_v3 }
   0xb   :  { %v22_v49 = vld [vmem:[%s337_s0 + $0x7] sm:$0x1]  ;;  %126 = vst.msk [vmem:[#allocation2 + $0x40] sm:$0xff] %vm117_vm2, %v113_v44  ;;  %v74_v50 = vsel %vm59_vm0, %v72_v33, %v73_v39  ;;  %v78_v52 = vrot.slane %v35_v47, 3  ;;  %v38_v55 = vld [vmem:[%s339_s2 + $0x78] sm:$0x7]  ;;  %v114_v56 = vsel %vm59_vm0, %v106_v46, %v75_v45 }
   0xc   :  { %127 = vst.msk [vmem:[#allocation2 + $0x48] sm:$0xff] %vm117_vm2, %v74_v50  ;;  %v79_v57 = vrot.slane %v36_v48, 3  ;;  %v81_v58 = vrot.slane %v37_v54, 3  ;;  %v108_v59 = vsel %vm100_vm1, %v22_v49, %v209_v3 }
   0xd   :  { %8 = vsyncpa [#allocation3], 0  ;;  %s177_s0 = smov [#allocation2]   ;;  %128 = vst.msk [vmem:[#allocation2 + $0x50] sm:$0xff] %vm117_vm2, %v114_v56  ;;  %v77_v60 = vsel %vm59_vm0, %v75_v45, %v76_v51  ;;  %v115_v61 = vsel %vm59_vm0, %v107_v53, %v78_v52  ;;  %v82_v62 = vrot.slane %v38_v55, 3 }
   0xe   :  { %s139_s6 = sshll.u32 %s177_s0, 4  ;;  %129 = vst.msk [vmem:[#allocation2 + $0x58] sm:$0xff] %vm117_vm2, %v77_v60  ;;  %130 = vst.msk [vmem:[#allocation2 + $0x60] sm:$0xff] %vm117_vm2, %v115_v61  ;;  %v80_v63 = vsel %vm59_vm0, %v78_v52, %v79_v57  ;;  %v116_v0 = vsel %vm59_vm0, %v108_v59, %v81_v58  ;;  %s140_s6 = int_to_ptr.vmem [resolvable:$true] %s139_s6 }
   0xf   :  { %131 = vst.msk [vmem:[#allocation2 + $0x68] sm:$0xff] %vm117_vm2, %v80_v63  ;;  %132 = vst.msk [vmem:[#allocation2 + $0x70] sm:$0xff] %vm117_vm2, %v116_v0  ;;  %v83_v1 = vsel %vm59_vm0, %v81_v58, %v82_v62  ;;  %s153_s2 = scalar_lea.vmem %s140_s6, 2048  ;;  %p158_p1 = scmp.lt.s32.totalorder %s140_s6, %s140_s6 }
  0x10   :  { %133 = vst.msk [vmem:[#allocation2 + $0x78] sm:$0xff] %vm117_vm2, %v83_v1  ;;  %p154_p0 = scmp.ne.s32.totalorder %s140_s6, %s153_s2  ;;  %p159_p2 = scmp.lt.s32.totalorder %s153_s2, %s153_s2 }
  0x12   :  { %p160_p3 = por %p159_p2, %p158_p1 }
  0x14   :  { %p161_p4 = pnand %p160_p3, %p154_p0 }
  0x16   :  { %164 = shalt.err (!%p161_p4)
}
  0x17   :  { %s165_s9 = scalar_lea.hbm %s340_s3, 2048 }
  0x18   :  { %p166_p5 = scmp.ne.s32.totalorder %s340_s3, %s165_s9  ;;  %p169_p6 = scmp.lt.u32.totalorder %s165_s9, %s340_s3 }
  0x1a   :  { %p171_p7 = pnand %p169_p6, %p166_p5 }
  0x1c   :  { %174 = shalt.err (!%p171_p7)
}
  0x1d   :  { %s178_s14 = smov 128   ;;  %s179_s15 = smov 8  }
  0x1e   :  { %145 = dma.vmem_to_hbm [thread:$0]  %s140_s6, 2048, %s340_s3, [#allocation3], %s178_s14, %s178_s14, %s179_s15  }
  0x1f   :  { %175 = dma.done.wait [#allocation3], 2048  }
  0x20   :  { %176 = vsyncadd [#allocation3], 4294965248 }
  0x21   :  { %149 = vsyncpa [#allocation3], 1 }

</bundles_post_ra>
